<compile_context>
chip_gen: v7x
topology: tpu7x:2x2x1
jax: 0.10.0
libtpu: 0.0.40
codegen_flags: <defaults>
</compile_context>

<pallas_src>
import functools

import numpy as np
import jax
import jax.numpy as jnp
from jax.experimental import pallas as pl
from jax.experimental.pallas import tpu as pltpu

D = 100        # embedding / hidden dim hardcoded in the torch module
DP = 128       # feature dim padded to full lane width
MAX_TILE = 512 # adjacency (dst, src) tile upper bound


def _round_up(n, m):
    return ((n + m - 1) // m) * m


# ---------------------------------------------------------------------------
# Pallas kernel: one RGCNConv layer over a compacted nonzero-tile schedule
# ---------------------------------------------------------------------------
def rgcn_conv_kernel(sched_r_ref, sched_s_ref, count_ref,      # SMEM (prefetch)
                     x_ref, adj_ref, y_ref, root_ref, bias_ref,
                     out_ref, *, max_steps, apply_relu):
    d = pl.program_id(0)   # dst tile                     ("parallel")
    j = pl.program_id(1)   # compacted nonzero-tile step  ("arbitrary")

    # init accumulator once per dst tile: self-loop (root) transform + bias
    @pl.when(j == 0)
    def _init():
        out_ref[...] = (jnp.dot(x_ref[...], root_ref[...],
                                preferred_element_type=jnp.float32)
                        + bias_ref[...])

    # out_tile += A[r, dst_tile, src_tile] @ Y[r, src_tile]
    # padded schedule entries (j >= count[d]) are skipped; their block indices
    # repeat the previous step's so the pipeline dedups the DMA
    @pl.when(j < count_ref[d])
    def _accumulate():
        out_ref[...] += jnp.dot(adj_ref[0], y_ref[0],
                                preferred_element_type=jnp.float32)

    if apply_relu:
        @pl.when(j == max_steps - 1)
        def _finalize():
            out_ref[...] = jnp.maximum(out_ref[...], 0.0)


def rgcn_conv(sched_r, sched_s, counts, x, adj, y, root, bias, *,
              tile, max_steps, apply_relu):
    """One RGCNConv layer via pallas_call (all operands already zero-padded).

    sched_r/sched_s: [n_t * max_steps] int32 compacted per-dst-tile lists of
                     nonzero (relation, src_tile) indices (scalar-prefetched)
    counts:          [n_t] int32 valid entries per dst tile
    x:    [n_pad, DP]         node features        (compute dtype)
    adj:  [R, n_pad, n_pad]   dense adjacency      (compute dtype)
    y:    [R, n_pad, DP]      precomputed X @ W_r  (compute dtype)
    root: [DP, DP] (compute dtype), bias: [1, DP] (f32)
    """
    n_pad, dp = x.shape
    n_t = n_pad // tile
    kernel = functools.partial(rgcn_conv_kernel, max_steps=max_steps,
                               apply_relu=apply_relu)

    def adj_map(d, j, sr, ss, cnt):
        idx = d * max_steps + j
        return (sr[idx], d, ss[idx])

    def y_map(d, j, sr, ss, cnt):
        idx = d * max_steps + j
        return (sr[idx], ss[idx], 0)

    grid_spec = pltpu.PrefetchScalarGridSpec(
        num_scalar_prefetch=3,
        grid=(n_t, max_steps),
        in_specs=[
            pl.BlockSpec((tile, dp), lambda d, j, sr, ss, c: (d, 0)),      # x[d]
            pl.BlockSpec((1, tile, tile), adj_map),                        # A tile
            pl.BlockSpec((1, tile, dp), y_map),                            # Y tile
            pl.BlockSpec((dp, dp), lambda d, j, sr, ss, c: (0, 0)),        # root
            pl.BlockSpec((1, dp), lambda d, j, sr, ss, c: (0, 0)),         # bias
        ],
        out_specs=pl.BlockSpec((tile, dp), lambda d, j, sr, ss, c: (d, 0)),
    )
    return pl.pallas_call(
        kernel,
        out_shape=jax.ShapeDtypeStruct((n_pad, dp), jnp.float32),
        grid_spec=grid_spec,
        compiler_params=pltpu.CompilerParams(
            # TODO(synk): on v7x, pltpu.CORE_PARALLEL on the dst axis would split
            # dst tiles across both TensorCores; "parallel" is kept for safety.
            dimension_semantics=("parallel", "arbitrary"),
            vmem_limit_bytes=48 * 1024 * 1024),   # headroom on v7x, ample elsewhere
    )(sched_r, sched_s, counts, x, adj, y, root, bias)


# ---------------------------------------------------------------------------
# Glue: padding, dense adjacency, compacted tile schedule, params, forward
# ---------------------------------------------------------------------------
def _pad_to(a, shape):
    return jnp.pad(a, [(0, t - s) for s, t in zip(a.shape, shape)])


def build_dense_adj(edge_index, edge_type, edge_norm, n_pad, num_rel):
    # A[r, dst, src] += norm (PyG source_to_target flow: src = edge_index[0]).
    # TODO(synk): for KG-scale graphs build a block-sparse (tile-CSR) structure
    # directly instead of a dense [R, n_pad, n_pad] tensor in HBM.
    src, dst = edge_index[0], edge_index[1]
    adj = jnp.zeros((num_rel, n_pad, n_pad), jnp.float32)
    return adj.at[edge_type, dst, src].add(edge_norm)


def build_tile_schedule(adj, tile):
    """Compacted per-dst-tile lists of nonzero (relation, src_tile) indices."""
    R, n_pad, _ = adj.shape
    n_t = n_pad // tile
    nz = np.asarray(jnp.any(
        adj.reshape(R, n_t, tile, n_t, tile) != 0, axis=(2, 4)))   # [R, n_t, n_t]
    per_dst = [[(r, s) for r in range(R) for s in range(n_t) if nz[r, d, s]]
               for d in range(n_t)]
    max_steps = max(1, max(len(p) for p in per_dst))
    sr = np.zeros((n_t, max_steps), np.int32)
    ss = np.zeros((n_t, max_steps), np.int32)
    cnt = np.zeros((n_t,), np.int32)
    for d, pairs in enumerate(per_dst):
        cnt[d] = len(pairs)
        last = pairs[-1] if pairs else (0, 0)
        for j in range(max_steps):
            r, s = pairs[j] if j < len(pairs) else last   # repeat -> DMA dedup
            sr[d, j], ss[d, j] = r, s
    return (jnp.asarray(sr.reshape(-1)), jnp.asarray(ss.reshape(-1)),
            jnp.asarray(cnt), max_steps)


def init_params(key, num_entities, num_relations, num_bases):
    R = num_relations * 2   # conv layers see forward + inverse relations
    ks = jax.random.split(key, 10)
    scale = 1.0 / jnp.sqrt(jnp.float32(D))
    p = {
        "emb": jax.random.normal(ks[0], (num_entities, D), jnp.float32),
        # relation_embedding only feeds distmult scoring, not the forward pass
        "rel_emb": jax.random.uniform(ks[1], (num_relations, D), jnp.float32,
                                      -0.1, 0.1),
    }
    for li, k0 in ((1, 2), (2, 6)):
        p[f"conv{li}_basis"] = jax.random.uniform(ks[k0 + 0], (num_bases, D, D),
                                                  jnp.float32, -scale, scale)
        p[f"conv{li}_att"] = jax.random.uniform(ks[k0 + 1], (R, num_bases),
                                                jnp.float32, -scale, scale)
        p[f"conv{li}_root"] = jax.random.uniform(ks[k0 + 2], (D, D),
                                                 jnp.float32, -scale, scale)
        p[f"conv{li}_bias"] = jnp.zeros((D,), jnp.float32)
    return p


def _layer_params(params, li, num_rel):
    # W_r = sum_b att[r, b] * basis[b]  (tiny, computed once in XLA)
    w = jnp.einsum("rb,bio->rio", params[f"conv{li}_att"],
                   params[f"conv{li}_basis"],
                   precision=jax.lax.Precision.HIGHEST)
    return (_pad_to(w, (num_rel, DP, DP)),
            _pad_to(params[f"conv{li}_root"], (DP, DP)),
            _pad_to(params[f"conv{li}_bias"].reshape(1, D), (1, DP)))


def rgcn_forward(params, entity, edge_index, edge_type, edge_norm,
                 num_relations, *, compute_dtype=jnp.bfloat16):
    R = num_relations * 2
    N = entity.shape[0]
    tile = min(MAX_TILE, _round_up(N, 128))
    n_pad = _round_up(N, tile)

    adj = build_dense_adj(edge_index, edge_type, edge_norm, n_pad, R)
    sched_r, sched_s, counts, max_steps = build_tile_schedule(adj, tile)
    adj_c = adj.astype(compute_dtype)

    x = _pad_to(params["emb"][entity], (n_pad, DP))   # embedding gather (glue, f32)

    for li, relu in ((1, True), (2, False)):
        w, root, bias = _layer_params(params, li, R)
        # hoisted per-relation projection: Y[r] = X @ W_r, one batched matmul
        y = jnp.einsum("nd,rdo->rno", x, w,
                       precision=jax.lax.Precision.HIGHEST).astype(compute_dtype)
        x = rgcn_conv(sched_r, sched_s, counts,
                      x.astype(compute_dtype), adj_c, y,
                      root.astype(compute_dtype), bias,
                      tile=tile, max_steps=max_steps, apply_relu=relu)
        # TODO(synk): F.dropout is identity in eval mode (training=False);
        # training-mode RNG dropout between the layers is not implemented.
    return x[:N, :D]


# ---------------------------------------------------------------------------
# Pure-JAX reference of the same semantics (unpadded, high precision)
# ---------------------------------------------------------------------------
def rgcn_conv_ref(x, adj, att, basis, root, bias, apply_relu):
    hi = jax.lax.Precision.HIGHEST
    w = jnp.einsum("rb,bio->rio", att, basis, precision=hi)
    agg = jnp.einsum("rij,jd->rid", adj, x, precision=hi)
    out = (jnp.einsum("rid,rdo->io", agg, w, precision=hi)
           + jnp.dot(x, root, precision=hi) + bias)
    return jnp.maximum(out, 0.0) if apply_relu else out


def rgcn_forward_ref(params, entity, edge_index, edge_type, edge_norm,
                     num_relations):
    R = num_relations * 2
    N = entity.shape[0]
    src, dst = edge_index[0], edge_index[1]
    adj = jnp.zeros((R, N, N), jnp.float32).at[edge_type, dst, src].add(edge_norm)
    x = params["emb"][entity]
    x = rgcn_conv_ref(x, adj, params["conv1_att"], params["conv1_basis"],
                      params["conv1_root"], params["conv1_bias"], True)
    x = rgcn_conv_ref(x, adj, params["conv2_att"], params["conv2_basis"],
                      params["conv2_root"], params["conv2_bias"], False)
    return x


if __name__ == "__main__":
    num_entities, num_relations, num_bases = 32, 4, 2
    N, E = num_entities, 64

    key = jax.random.PRNGKey(0)
    k_param, k_src, k_dst, k_typ, k_nrm = jax.random.split(key, 5)

    params = init_params(k_param, num_entities, num_relations, num_bases)

    entity = jnp.arange(N, dtype=jnp.int32)
    edge_index = jnp.stack([
        jax.random.randint(k_src, (E,), 0, N, dtype=jnp.int32),
        jax.random.randint(k_dst, (E,), 0, N, dtype=jnp.int32),
    ], axis=0)                                                        # [2, E]
    edge_type = jax.random.randint(k_typ, (E,), 0, num_relations * 2,
                                   dtype=jnp.int32)                   # [E]
    edge_norm = jax.random.uniform(k_nrm, (E,), jnp.float32, 0.1, 1.0)  # [E]

    ref = rgcn_forward_ref(params, entity, edge_index, edge_type, edge_norm,
                           num_relations)

    # f32 streaming path: tight check of the kernel structure vs. the reference
    out_f32 = rgcn_forward(params, entity, edge_index, edge_type, edge_norm,
                           num_relations, compute_dtype=jnp.float32)
    out_f32 = jax.block_until_ready(out_f32)
    if not jnp.allclose(out_f32, ref, rtol=2e-3, atol=2e-3):
        raise AssertionError(
            f"f32 mismatch: max abs err = {jnp.max(jnp.abs(out_f32 - ref))}")

    # bf16 streaming path (default / recommended): operand rounding -> looser
    # tolerance; accumulation stays f32 via preferred_element_type
    out_bf16 = rgcn_forward(params, entity, edge_index, edge_type, edge_norm,
                            num_relations, compute_dtype=jnp.bfloat16)
    out_bf16 = jax.block_until_ready(out_bf16)
    if not jnp.allclose(out_bf16, ref, rtol=5e-2, atol=5e-2):
        raise AssertionError(
            f"bf16 mismatch: max abs err = {jnp.max(jnp.abs(out_bf16 - ref))}")

    print("KERNEL_OK")
</pallas_src>

<mosaic_0001>
module attributes {stable_mosaic.version = 11 : i64} {
  func.func @rgcn_conv_kernel(%arg0: i32, %arg1: i32, %arg2: memref<8xi32, #tpu.memory_space<smem>>, %arg3: memref<8xi32, #tpu.memory_space<smem>>, %arg4: memref<1xi32, #tpu.memory_space<smem>>, %arg5: memref<128x128xf32, #tpu.memory_space<vmem>>, %arg6: memref<1x128x128xf32, #tpu.memory_space<vmem>>, %arg7: memref<1x128x128xf32, #tpu.memory_space<vmem>>, %arg8: memref<128x128xf32, #tpu.memory_space<vmem>>, %arg9: memref<1x128xf32, #tpu.memory_space<vmem>>, %arg10: memref<128x128xf32, #tpu.memory_space<vmem>>) attributes {dimension_semantics = [#tpu.dimension_semantics<parallel>, #tpu.dimension_semantics<arbitrary>], iteration_bounds = array<i64: 1, 8>, scalar_prefetch = 3 : i64, scratch_operands = 0 : i64, tpu.core_type = #tpu.core_type<tc>, window_params = [{transform_indices = @transform_0, window_bounds = array<i64: 128, 128>}, {transform_indices = @transform_1, window_bounds = array<i64: 1, 128, 128>}, {transform_indices = @transform_2, window_bounds = array<i64: 1, 128, 128>}, {pipeline_mode = #tpu.pipeline_mode<synchronous>, transform_indices = @transform_3, window_bounds = array<i64: 128, 128>}, {pipeline_mode = #tpu.pipeline_mode<synchronous>, transform_indices = @transform_4, window_bounds = array<i64: 1, 128>}, {transform_indices = @transform_5, window_bounds = array<i64: 128, 128>}]} {
    %c0_i32 = arith.constant 0 : i32
    %0 = arith.cmpi eq, %arg1, %c0_i32 : i32
    %1 = arith.extui %0 : i1 to i32
    %c0_i32_0 = arith.constant 0 : i32
    %2 = arith.cmpi ne, %1, %c0_i32_0 : i32
    scf.if %2 {
      %c0 = arith.constant 0 : index
      %c0_3 = arith.constant 0 : index
      %11 = vector.load %arg5[%c0, %c0_3] : memref<128x128xf32, #tpu.memory_space<vmem>>, vector<128x128xf32>
      %c0_4 = arith.constant 0 : index
      %c0_5 = arith.constant 0 : index
      %12 = vector.load %arg8[%c0_4, %c0_5] : memref<128x128xf32, #tpu.memory_space<vmem>>, vector<128x128xf32>
      %cst = arith.constant dense<0.000000e+00> : vector<128x128xf32>
      %13 = tpu.matmul %11, %12, %cst {dimension_numbers = #tpu.dot_dimension_numbers<[1], [0], [0], [1], [0, 0, 1, 1], [], []>} : vector<128x128xf32>, vector<128x128xf32>, vector<128x128xf32> -> vector<128x128xf32>
      %c0_6 = arith.constant 0 : index
      %c0_7 = arith.constant 0 : index
      %14 = vector.load %arg9[%c0_6, %c0_7] : memref<1x128xf32, #tpu.memory_space<vmem>>, vector<1x128xf32>
      %15 = vector.broadcast %14 : vector<1x128xf32> to vector<128x128xf32>
      %16 = arith.addf %13, %15 : vector<128x128xf32>
      %c0_8 = arith.constant 0 : index
      %c0_9 = arith.constant 0 : index
      %17 = vector.load %arg10[%c0_8, %c0_9] : memref<128x128xf32, #tpu.memory_space<vmem>>, vector<128x128xf32>
      tpu.vector_store %arg10[%c0_8, %c0_9], %16 {strides = array<i32>} : memref<128x128xf32, #tpu.memory_space<vmem>>, vector<128x128xf32>,
    } else {
    }
    %3 = arith.index_cast %arg0 : i32 to index
    %4 = memref.load %arg4[%3] : memref<1xi32, #tpu.memory_space<smem>>
    %5 = arith.cmpi slt, %arg1, %4 : i32
    %6 = arith.extui %5 : i1 to i32
    %c0_i32_1 = arith.constant 0 : i32
    %7 = arith.cmpi ne, %6, %c0_i32_1 : i32
    scf.if %7 {
      %c0 = arith.constant 0 : index
      %c0_3 = arith.constant 0 : index
      %11 = vector.load %arg10[%c0, %c0_3] : memref<128x128xf32, #tpu.memory_space<vmem>>, vector<128x128xf32>
      %c0_4 = arith.constant 0 : index
      %c0_5 = arith.constant 0 : index
      %c0_6 = arith.constant 0 : index
      %12 = vector.load %arg6[%c0_4, %c0_5, %c0_6] : memref<1x128x128xf32, #tpu.memory_space<vmem>>, vector<1x128x128xf32>
      %13 = vector.shape_cast %12 : vector<1x128x128xf32> to vector<128x128xf32>
      %c0_7 = arith.constant 0 : index
      %c0_8 = arith.constant 0 : index
      %c0_9 = arith.constant 0 : index
      %14 = vector.load %arg7[%c0_7, %c0_8, %c0_9] : memref<1x128x128xf32, #tpu.memory_space<vmem>>, vector<1x128x128xf32>
      %15 = vector.shape_cast %14 : vector<1x128x128xf32> to vector<128x128xf32>
      %cst = arith.constant dense<0.000000e+00> : vector<128x128xf32>
      %16 = tpu.matmul %13, %15, %cst {dimension_numbers = #tpu.dot_dimension_numbers<[1], [0], [0], [1], [0, 0, 1, 1], [], []>} : vector<128x128xf32>, vector<128x128xf32>, vector<128x128xf32> -> vector<128x128xf32>
      %17 = arith.addf %11, %16 : vector<128x128xf32>
      %c0_10 = arith.constant 0 : index
      %c0_11 = arith.constant 0 : index
      %18 = vector.load %arg10[%c0_10, %c0_11] : memref<128x128xf32, #tpu.memory_space<vmem>>, vector<128x128xf32>
      tpu.vector_store %arg10[%c0_10, %c0_11], %17 {strides = array<i32>} : memref<128x128xf32, #tpu.memory_space<vmem>>, vector<128x128xf32>,
    } else {
    }
    %c7_i32 = arith.constant 7 : i32
    %8 = arith.cmpi eq, %arg1, %c7_i32 : i32
    %9 = arith.extui %8 : i1 to i32
    %c0_i32_2 = arith.constant 0 : i32
    %10 = arith.cmpi ne, %9, %c0_i32_2 : i32
    scf.if %10 {
      %c0 = arith.constant 0 : index
      %c0_3 = arith.constant 0 : index
      %11 = vector.load %arg10[%c0, %c0_3] : memref<128x128xf32, #tpu.memory_space<vmem>>, vector<128x128xf32>
      %cst = arith.constant 0.000000e+00 : f32
      %12 = vector.broadcast %cst : f32 to vector<128x128xf32>
      %13 = arith.maximumf %11, %12 : vector<128x128xf32>
      %c0_4 = arith.constant 0 : index
      %c0_5 = arith.constant 0 : index
      %14 = vector.load %arg10[%c0_4, %c0_5] : memref<128x128xf32, #tpu.memory_space<vmem>>, vector<128x128xf32>
      tpu.vector_store %arg10[%c0_4, %c0_5], %13 {strides = array<i32>} : memref<128x128xf32, #tpu.memory_space<vmem>>, vector<128x128xf32>,
    } else {
    }
    return
  }
  func.func @transform_0(%arg0: i32, %arg1: i32, %arg2: memref<8xi32, #tpu.memory_space<smem>>, %arg3: memref<8xi32, #tpu.memory_space<smem>>, %arg4: memref<1xi32, #tpu.memory_space<smem>>) -> (i32, i32) {
    %c0_i32 = arith.constant 0 : i32
    %c0_i32_0 = arith.constant 0 : i32
    return %arg0, %c0_i32 : i32, i32
  }
  func.func @transform_1(%arg0: i32, %arg1: i32, %arg2: memref<8xi32, #tpu.memory_space<smem>>, %arg3: memref<8xi32, #tpu.memory_space<smem>>, %arg4: memref<1xi32, #tpu.memory_space<smem>>) -> (i32, i32, i32) {
    %c8_i32 = arith.constant 8 : i32
    %0 = arith.muli %arg0, %c8_i32 : i32
    %1 = arith.addi %0, %arg1 : i32
    %2 = arith.index_cast %1 : i32 to index
    %3 = memref.load %arg2[%2] : memref<8xi32, #tpu.memory_space<smem>>
    %4 = arith.index_cast %1 : i32 to index
    %5 = memref.load %arg3[%4] : memref<8xi32, #tpu.memory_space<smem>>
    %c0_i32 = arith.constant 0 : i32
    return %3, %arg0, %5 : i32, i32, i32
  }
  func.func @transform_2(%arg0: i32, %arg1: i32, %arg2: memref<8xi32, #tpu.memory_space<smem>>, %arg3: memref<8xi32, #tpu.memory_space<smem>>, %arg4: memref<1xi32, #tpu.memory_space<smem>>) -> (i32, i32, i32) {
    %c8_i32 = arith.constant 8 : i32
    %0 = arith.muli %arg0, %c8_i32 : i32
    %1 = arith.addi %0, %arg1 : i32
    %2 = arith.index_cast %1 : i32 to index
    %3 = memref.load %arg2[%2] : memref<8xi32, #tpu.memory_space<smem>>
    %4 = arith.index_cast %1 : i32 to index
    %5 = memref.load %arg3[%4] : memref<8xi32, #tpu.memory_space<smem>>
    %c0_i32 = arith.constant 0 : i32
    %c0_i32_0 = arith.constant 0 : i32
    return %3, %5, %c0_i32 : i32, i32, i32
  }
  func.func @transform_3(%arg0: i32, %arg1: i32, %arg2: memref<8xi32, #tpu.memory_space<smem>>, %arg3: memref<8xi32, #tpu.memory_space<smem>>, %arg4: memref<1xi32, #tpu.memory_space<smem>>) -> (i32, i32) {
    %c0_i32 = arith.constant 0 : i32
    %c0_i32_0 = arith.constant 0 : i32
    %c0_i32_1 = arith.constant 0 : i32
    return %c0_i32, %c0_i32_0 : i32, i32
  }
  func.func @transform_4(%arg0: i32, %arg1: i32, %arg2: memref<8xi32, #tpu.memory_space<smem>>, %arg3: memref<8xi32, #tpu.memory_space<smem>>, %arg4: memref<1xi32, #tpu.memory_space<smem>>) -> (i32, i32) {
    %c0_i32 = arith.constant 0 : i32
    %c0_i32_0 = arith.constant 0 : i32
    %c0_i32_1 = arith.constant 0 : i32
    return %c0_i32, %c0_i32_0 : i32, i32
  }
  func.func @transform_5(%arg0: i32, %arg1: i32, %arg2: memref<8xi32, #tpu.memory_space<smem>>, %arg3: memref<8xi32, #tpu.memory_space<smem>>, %arg4: memref<1xi32, #tpu.memory_space<smem>>) -> (i32, i32) {
    %c0_i32 = arith.constant 0 : i32
    %c0_i32_0 = arith.constant 0 : i32
    return %arg0, %c0_i32 : i32, i32
  }
}

</mosaic_0001>

<bundles_post_ra>
// kernel: tpu_custom_call.1
= control target key start
LH: loop header
LB: loop body
LE: loop exit
PB: predicated region body
PF: predicated region fallthrough
CT: control target
= control target key end

     0   :  { %s2176_s0 = inlined_call_operand.vmem [shape: s32[8], index: 0, kind: input, shape index: {}]   ;;  %s2177_s3 = inlined_call_operand.hbm [shape: f32[128,128], index: 3, kind: input, shape index: {}]   ;;  %s2178_s4 = inlined_call_operand.hbm [shape: f32[8,128,128], index: 4, kind: input, shape index: {}]   ;;  %s2179_s5 = inlined_call_operand.hbm [shape: f32[8,128,128], index: 5, kind: input, shape index: {}]   ;;  %s2180_s6 = inlined_call_operand.hbm [shape: f32[128,128], index: 6, kind: input, shape index: {}]   ;;  %s2181_s7 = inlined_call_operand.vmem [shape: f32[1,128], index: 7, kind: input, shape index: {}]   ;;  %s2182_s8 = inlined_call_operand.hbm [shape: f32[128,128], index: 8, kind: output, shape index: {}]   ;;  %s2183_s1 = inlined_call_operand.vmem [shape: s32[8], index: 1, kind: input, shape index: {}]   ;;  %s2184_s2 = inlined_call_operand.<no memory space> [shape: s32[1], index: 2, kind: input, shape index: {}]  }
   0x1   :  { %2197 = sst [smem:[#allocation33_spill]] %s2177_s3  ;;  %s13_s29 = sshll.u32 %s2176_s0, 4  ;;  %s14_s29 = int_to_ptr.vmem [resolvable:$true] %s13_s29 }
   0x2   :  { %2198 = sst [smem:[#allocation34_spill]] %s2178_s4  ;;  %s17_s10 = sshll.u32 %s2183_s1, 4  ;;  %s18_s10 = int_to_ptr.vmem [resolvable:$true] %s17_s10 }
   0x3   :  { %2199 = sst [smem:[#allocation35_spill]] %s2181_s7  ;;  %s1425_s11 = scalar_lea.vmem %s14_s29, 16 }
   0x4   :  { %2200 = sst [smem:[#allocation36_spill]] %s2182_s8  ;;  %p1426_p0 = scmp.ne.s32.totalorder %s14_s29, %s1425_s11 }
   0x5   :  { %p1430_p1 = scmp.lt.s32.totalorder %s14_s29, %s14_s29  ;;  %p1431_p2 = scmp.lt.s32.totalorder %s1425_s11, %s1425_s11 }
   0x7   :  { %p1432_p3 = por %p1431_p2, %p1430_p1 }
   0x9   :  { %p1433_p4 = pnand %p1432_p3, %p1426_p0 }
   0xb   :  { %1436 = shalt.err (!%p1433_p4)  }
   0xc   :  { %s1685_s12 = smov [#allocation3]   ;;  %s1437_s13 = scalar_lea.vmem %s18_s10, 16 }
   0xd   :  { %16 = dma.vmem_to_smem %s14_s29, 16, %s1685_s12, [#allocation2] }
   0xe   :  { %p1438_p5 = scmp.ne.s32.totalorder %s18_s10, %s1437_s13  ;;  %p1442_p6 = scmp.lt.s32.totalorder %s18_s10, %s18_s10 }
   0xf   :  { %p1443_p7 = scmp.lt.s32.totalorder %s1437_s13, %s1437_s13 }
  0x11   :  { %p1444_p8 = por %p1443_p7, %p1442_p6 }
  0x13   :  { %p1445_p9 = pnand %p1444_p8, %p1438_p5 }
  0x15   :  { %1448 = shalt.err (!%p1445_p9)  }
  0x16   :  { %s1686_s0 = smov [#allocation4]   ;;  %21 = sst [smem:[#allocation5]] %s2184_s2 }
  0x17   :  { %20 = dma.vmem_to_smem %s18_s10, 16, %s1686_s0, [#allocation2] }
  0x18   :  { %1627 = dma.done.wait [#allocation2], 32 }
  0x19   :  { %1628 = vsyncadd [#allocation2], 4294967264 }
  0x1a   :  { %23 = sfence }
  0x1b   :  { %24 = vsyncpa [#allocation7], 0 }
  0x1c   :  { %25 = vsyncpa [#allocation10], 0 }
  0x1d   :  { %27 = vsyncpa [#allocation10 + $0x1], 0 }
  0x1e   :  { %28 = vsyncpa [#allocation13], 0 }
  0x1f   :  { %29 = vsyncpa [#allocation8], 0  ;;  %s1750_s15 = smov 0   ;;  %s1752_s16 = smov 0  }
  0x20   :  { %s1754_s17 = smov 0   ;;  %s1756_s18 = smov 0  }
  0x21   :  { %s1758_s19 = smov 0   ;;  %s1760_s20 = smov 0  }
  0x22   :  { %s1762_s2 = smov 0   ;;  %s1764_s21 = smov 0  }
  0x23   :  { %s1766_s22 = smov 0  }
  0x24 LB: > { %2201 = sst [smem:[#allocation29_spill]] %s1671_s20  ;;  %s44_s23 = sadd.s32 1, %s1679_s21  ;;  %s1683_s22 = sphi %s1766_s22, %s35_s22   ;;  %s1679_s21 = sphi %s1764_s21, %s2245_s21   ;;  %s1675_s2 = sphi %s1762_s2, %s2244_s2   ;;  %s1671_s20 = sphi %s1760_s20, %s2237_s20   ;;  %s1667_s19 = sphi %s1758_s19, %s2243_s19   ;;  %s1663_s18 = sphi %s1756_s18, %s2242_s18   ;;  %s1659_s17 = sphi %s1754_s17, %s2241_s17   ;;  %s1655_s16 = sphi %s1752_s16, %s2240_s16   ;;  %s1651_s15 = sphi %s1750_s15, %s2239_s15  }
  0x25   : > { %2202 = sst [smem:[#allocation30_spill]] %s1675_s2  ;;  %p45_p10 = scmp.ge.s32.totalorder %s44_s23, 8 }
  0x26   : > { %s79_s24 = sld [smem:[#allocation3 + %s1679_s21]]  ;;  %s92_s26 = sadd.s32 1, %s1671_s20 }
  0x27   : > { %s80_s25 = sld [smem:[#allocation4 + %s1679_s21]]  ;;  %p99_p11 = scmp.ne.s32.totalorder %s1671_s20, %s1667_s19 }
  0x28   : > { %s2247_s23 = smov (%p45_p10, %s44_s23), 0  ;;  %p2187_p12 = scmp.eq.s32.totalorder %s1683_s22, 0 }
  0x29   : > { %2203 = sst [smem:[#allocation31_spill]] %s2247_s23  ;;  %p2186_p0 = scmp.lt.s32.totalorder %s1683_s22, 8 }
  0x2a   : > { %s83_s27 = sld [smem:[#allocation3 + %s2247_s23]]  ;;  %p1808_p13 = por %p2187_p12, %p99_p11 }
  0x2b   : > { %s84_s28 = sld [smem:[#allocation4 + %s2247_s23]]  ;;  %s267_s9 = sand.u32 1, %s1671_s20  }
  0x2c   : > { %s999_s10 = sshll.u32 %s267_s9, 7  ;;  %p1819_p1 = pnand %p2186_p0, %p1808_p13 }
  0x2d   : > { %s269_s1 = scalar_lea.vmem [#allocation9], %s999_s10  ;;  %s1842_s10 = sadd.s32 4294967295, %s1683_s22  }
  0x2e   : > { %s283_s14 = sshll.u32 %s269_s1, 4  ;;  %p105_p3 = scmp.ne.s32.totalorder %s1667_s19, %s1663_s18  ;;  %s1823_s14 = int_to_ptr.vmem [resolvable:$true] %s283_s14 }
  0x2f   : > { %s1295_s9 = scalar_select %p1808_p13, [#allocation3], [#allocation15] }
  0x30   : > { %s85_s12 = ssub.s32 %s79_s24, %s83_s27  ;;  %p2188_p4 = scmp.eq.s32.totalorder %s1842_s10, 0 }
  0x31   : > { %s88_s13 = ssub.s32 %s80_s25, %s84_s28  ;;  %s2249_s9 = smov (!%p2186_p0, %s1295_s9), [#allocation19] }
  0x32   : > { %s89_s0 = sor.u32 %s88_s13, %s85_s12  ;;  %p141_p5 = scmp.ne.s32.totalorder %s1655_s16, %s1651_s15 }
  0x33   : > { %p90_p2 = scmp.eq.s32.totalorder %s89_s0, 0  ;;  %p1852_p7 = por %p2188_p4, %p105_p3 }
  0x34   : > { %s1296_s8 = scalar_select %p1808_p13, %s1679_s21, 0 }
  0x35   : > { %s1828_s30 = scalar_select %p90_p2, %s1671_s20, %s92_s26  }
  0x36   : > { %s2251_s8 = smov (!%p2186_p0, %s1296_s8), 0  ;;  %s2208_s4 = sld [smem:[#allocation34_spill]] }
  0x37   : > { %2206 = sst [smem:[#allocation32_spill]] %s1828_s30  ;;  %p1863_p8 = por %p141_p5, %p2188_p4 }
  0x38   : > { %s1297_s24 = scalar_select %p1808_p13, [#allocation4], [#allocation16] }
  0x39   : > { %s272_s25 = sld [smem:[%s2249_s9 + %s2251_s8]]  ;;  %s2210_s18 = sand.u32 1, %s1683_s22  }
  0x3a   : > { %s2253_s24 = smov (!%p2186_p0, %s1297_s24), [#allocation20]  ;;  %s1869_s1 = scalar_lea.sflag [#allocation10], %s2210_s18 }
  0x3b   : > { %s273_s27 = sld [smem:[%s2253_s24 + %s2251_s8]]  ;;  %p1451_p10 = pneg %p1819_p1 }
  0x3c   : > { %s2207_s12 = scalar_select %p1852_p7, 1, 0 }
  0x3d   : > { %s2209_s15 = scalar_select %p1863_p8, 1, 0 }
  0x3f   : > { %s1000_s28 = sshll.u32 %s272_s25, 4 }
  0x41   : > { %s280_s26 = sadd.s32 %s1000_s28, %s273_s27  ;;  %s1454_s27 = scalar_lea.hbm %s2208_s4, 16384 }
  0x42   : > { %s1001_s29 = sshll.u32 %s280_s26, 7 }
  0x43   : > { %s1859_s0 = scalar_lea.hbm %s2208_s4, %s1001_s29 }
  0x44   : > { %s1449_s9 = scalar_lea.hbm %s1859_s0, 2048  ;;  %p1455_p2 = scmp.lt.u32.totalorder %s1859_s0, %s2208_s4 }
  0x45   : > { %p1450_p9 = scmp.ne.s32.totalorder %s1859_s0, %s1449_s9  ;;  %p1456_p3 = scmp.lt.u32.totalorder %s1454_s27, %s1449_s9 }
  0x46   : > { %p1458_p0 = scmp.lt.u32.totalorder %s1449_s9, %s1859_s0 }
  0x47   : > { %p1452_p11 = pnand %p1451_p10, %p1450_p9  ;;  %p1457_p5 = por %p1456_p3, %p1455_p2 }
  0x49   : > { %p1453_p13 = pneg %p1452_p11  ;;  %p1459_p12 = por %p1458_p0, %p1457_p5 }
  0x4b   : > { %p1460_p4 = pnand %p1459_p12, %p1453_p13 }
  0x4d   : > { %1463 = shalt.err (!%p1460_p4)
}
  0x4e   : > { %s1464_s29 = scalar_lea.vmem %s1823_s14, 2048  ;;  %s1687_s13 = smov [#allocation9]  }
  0x4f   : > { %p1465_p9 = scmp.ne.s32.totalorder %s1823_s14, %s1464_s29  ;;  %s1469_s8 = sshll.u32 %s1687_s13, 4  ;;  %s1470_s8 = int_to_ptr.vmem [resolvable:$false] %s1469_s8 }
  0x50   : > { %s1471_s18 = scalar_lea.vmem %s1470_s8, 4096  ;;  %p1472_p8 = scmp.lt.s32.totalorder %s1823_s14, %s1470_s8 }
  0x51   : > { %p1467_p11 = pnand %p1465_p9, %p1451_p10  ;;  %p1473_p2 = scmp.lt.s32.totalorder %s1471_s18, %s1464_s29 }
  0x53   : > { %p1468_p6 = pneg %p1467_p11  ;;  %p1474_p3 = por %p1473_p2, %p1472_p8 }
  0x55   : > { %p1475_p0 = pnand %p1474_p3, %p1468_p6 }
  0x57   : > { %1478 = shalt.err (!%p1475_p0)
}
  0x58   : > { %s2190_s9 = smov 128   ;;  %s2192_s24 = smov 8  }
  0x59   : > { %1329 = dma.hbm_to_vmem [thread:$0]  (!%p1819_p1), %s1859_s0, 2048, %s1823_s14, %s1869_s1, %s2190_s9, %s2190_s9, %s2192_s24  }
  0x5a   : > { %p220_p12 = scmp.lt.s32.totalorder %s1683_s22, 9  ;;  %p2211_p4 = scmp.ge.s32.totalorder %s1683_s22, 1 }
  0x5b   : > { %s1690_s27 = smov [#allocation6]   ;;  %s1691_s26 = smov [#allocation12]  }
  0x5c   : > { %p1903_p6 = pnand %p2211_p4, %p220_p12  ;;  %s235_s28 = sshll.u32 %s1690_s27, 4  ;;  %s1907_s28 = int_to_ptr.vmem [resolvable:$true] %s235_s28 }
  0x5d   : > { %s248_s29 = sshll.u32 %s1691_s26, 4  ;;  %s1914_s11 = sld [smem:[#allocation3 + %s1679_s21]]  ;;  %s1911_s29 = int_to_ptr.vmem [resolvable:$true] %s248_s29 }
  0x5e   : > { %p1315_p8 = pneg %p1903_p6  ;;  %p2213_p1 = scmp.eq.s32.totalorder %s1842_s10, 0 }
  0x5f   : > { %s1923_s0 = sld [smem:[#allocation4 + %s1679_s21]] }
  0x60   : > { %p1918_p10 = pnand %p1315_p8, %p2213_p1  ;;  %s1926_s13 = sld [smem:[#allocation3 + %s2247_s23]] }
  0x61   : > { %s1929_s8 = sld [smem:[#allocation4 + %s2247_s23]] }
  0x62   : > { %s2215_s3 = sld [smem:[#allocation33_spill]]  ;;  %p1481_p5 = pneg %p1918_p10 }
  0x68   : > { %s1479_s26 = scalar_lea.hbm %s2215_s3, 2048 }
  0x69   : > { %p1480_p13 = scmp.ne.s32.totalorder %s2215_s3, %s1479_s26  ;;  %p1486_p2 = scmp.lt.u32.totalorder %s1479_s26, %s2215_s3 }
  0x6b   : > { %p1482_p9 = pnand %p1481_p5, %p1480_p13 }
  0x6d   : > { %p1483_p11 = pneg %p1482_p9 }
  0x6f   : > { %p1488_p3 = pnand %p1486_p2, %p1483_p11 }
  0x71   : > { %1491 = shalt.err (!%p1488_p3)
}
  0x72   : > { %s1492_s18 = scalar_lea.vmem %s1907_s28, 2048  ;;  %p1500_p8 = scmp.lt.s32.totalorder %s1907_s28, %s1907_s28 }
  0x73   : > { %p1493_p0 = scmp.ne.s32.totalorder %s1907_s28, %s1492_s18  ;;  %p1501_p1 = scmp.lt.s32.totalorder %s1492_s18, %s1492_s18 }
  0x75   : > { %p1495_p12 = pnand %p1493_p0, %p1481_p5  ;;  %p1502_p13 = por %p1501_p1, %p1500_p8 }
  0x77   : > { %p1496_p4 = pneg %p1495_p12 }
  0x79   : > { %p1503_p9 = pnand %p1502_p13, %p1496_p4 }
  0x7b   : > { %1506 = shalt.err (!%p1503_p9)
}
  0x7c   : > { %s2216_s4 = smov 8   ;;  %s2217_s30 = smov 128  }
  0x7d   : > { %1318 = dma.hbm_to_vmem [thread:$0]  (!%p1918_p10), %s2215_s3, 2048, %s1907_s28, [#allocation7], %s2217_s30, %s2217_s30, %s2216_s4  }
  0x7e   : > { %s1507_s23 = scalar_lea.hbm %s2180_s6, 2048 }
  0x7f   : > { %p1508_p11 = scmp.ne.s32.totalorder %s2180_s6, %s1507_s23  ;;  %p1514_p0 = scmp.lt.u32.totalorder %s1507_s23, %s2180_s6 }
  0x81   : > { %p1510_p2 = pnand %p1508_p11, %p1481_p5 }
  0x83   : > { %p1511_p3 = pneg %p1510_p2 }
  0x85   : > { %p1516_p12 = pnand %p1514_p0, %p1511_p3 }
  0x87   : > { %1519 = shalt.err (!%p1516_p12)
}
  0x88   : > { %s1520_s28 = scalar_lea.vmem %s1911_s29, 2048  ;;  %p1528_p13 = scmp.lt.s32.totalorder %s1911_s29, %s1911_s29 }
  0x89   : > { %p1521_p4 = scmp.ne.s32.totalorder %s1911_s29, %s1520_s28  ;;  %p1529_p9 = scmp.lt.s32.totalorder %s1520_s28, %s1520_s28 }
  0x8b   : > { %p1523_p8 = pnand %p1521_p4, %p1481_p5  ;;  %p1530_p11 = por %p1529_p9, %p1528_p13 }
  0x8d   : > { %p1524_p1 = pneg %p1523_p8 }
  0x8f   : > { %p1531_p2 = pnand %p1530_p11, %p1524_p1 }
  0x91   : > { %1534 = shalt.err (!%p1531_p2)
}
  0x92   : > { %1321 = dma.hbm_to_vmem [thread:$0]  (!%p1918_p10), %s2180_s6, 2048, %s1911_s29, [#allocation13], %s2217_s30, %s2217_s30, %s2216_s4  }
  0x93   : > { %p135_p5 = scmp.ne.s32.totalorder %s1659_s17, %s1655_s16  ;;  %s123_s2 = ssub.s32 %s1914_s11, %s1926_s13 }
  0x94   : > { %p2218_p3 = scmp.eq.s32.totalorder %s1683_s22, 0  ;;  %s124_s14 = ssub.s32 %s1923_s0, %s1929_s8 }
  0x95   : > { %s125_s9 = sor.u32 %s124_s14, %s123_s2  ;;  %s128_s24 = sadd.s32 1, %s1659_s17 }
  0x96   : > { %p1995_p0 = por %p135_p5, %p2218_p3  ;;  %p126_p12 = scmp.eq.s32.totalorder %s125_s9, 0 }
  0x97   : > { %s295_s27 = sand.u32 1, %s1659_s17   ;;  %p2220_p10 = scmp.lt.s32.totalorder %s1683_s22, 8 }
  0x98   : > { %s1300_s29 = scalar_select %p1995_p0, [#allocation3], [#allocation17] }
  0x99   : > { %s2006_s26 = scalar_select %p126_p12, %s1659_s17, %s128_s24  }
  0x9a   : > { %s1301_s11 = scalar_select %p1995_p0, %s1679_s21, 0 }
  0x9b   : > { %s2255_s29 = smov (!%p2220_p10, %s1300_s29), [#allocation21]  ;;  %p2221_p4 = pmov %p2220_p10 }
  0x9c   : > { %s1302_s13 = scalar_select %p1995_p0, [#allocation4], [#allocation18] }
  0x9d   : > { %s2257_s11 = smov (!%p2221_p4, %s1301_s11), 0  ;;  %s1002_s18 = sshll.u32 %s295_s27, 7 }
  0x9e   : > { %s300_s28 = sld [smem:[%s2255_s29 + %s2257_s11]]  ;;  %p2222_p8 = pmov %p2221_p4 }
  0x9f   : > { %p2223_p1 = pmov %p2221_p4  ;;  %s297_s20 = scalar_lea.vmem [#allocation11], %s1002_s18 }
  0xa0   : > { %s2259_s13 = smov (!%p2222_p8, %s1302_s13), [#allocation22]  ;;  %s310_s2 = sshll.u32 %s297_s20, 4  ;;  %s2027_s2 = int_to_ptr.vmem [resolvable:$true] %s310_s2 }
  0xa1   : > { %p2023_p13 = pnand %p2223_p1, %p1995_p0  ;;  %s301_s8 = sld [smem:[%s2259_s13 + %s2257_s11]] }
  0xa2   : > { %s1540_s18 = scalar_lea.hbm %s2179_s5, 16384 }
  0xa3   : > { %p1537_p11 = pneg %p2023_p13 }
  0xa4   : > { %s1004_s7 = sshll.u32 %s300_s28, 4 }
  0xa7   : > { %s1003_s14 = sshll.u32 %s301_s8, 4 }
  0xa8   : > { %s307_s9 = sadd.s32 %s1004_s7, %s1003_s14 }
  0xa9   : > { %s1005_s24 = sshll.u32 %s307_s9, 7 }
  0xaa   : > { %s2032_s23 = scalar_lea.hbm %s2179_s5, %s1005_s24 }
  0xab   : > { %s1535_s3 = scalar_lea.hbm %s2032_s23, 2048  ;;  %p1541_p3 = scmp.lt.u32.totalorder %s2032_s23, %s2179_s5 }
  0xac   : > { %p1536_p9 = scmp.ne.s32.totalorder %s2032_s23, %s1535_s3  ;;  %p1542_p0 = scmp.lt.u32.totalorder %s1540_s18, %s1535_s3 }
  0xad   : > { %p1544_p10 = scmp.lt.u32.totalorder %s1535_s3, %s2032_s23 }
  0xae   : > { %p1538_p2 = pnand %p1537_p11, %p1536_p9  ;;  %p1543_p12 = por %p1542_p0, %p1541_p3 }
  0xb0   : > { %p1539_p5 = pneg %p1538_p2  ;;  %p1545_p4 = por %p1544_p10, %p1543_p12 }
  0xb2   : > { %p1546_p8 = pnand %p1545_p4, %p1539_p5 }
  0xb4   : > { %1549 = shalt.err (!%p1546_p8)
}
  0xb5   : > { %s1550_s7 = scalar_lea.vmem %s2027_s2, 2048  ;;  %s1692_s20 = smov [#allocation11]  }
  0xb6   : > { %p1551_p1 = scmp.ne.s32.totalorder %s2027_s2, %s1550_s7  ;;  %s1555_s14 = sshll.u32 %s1692_s20, 4  ;;  %s1556_s14 = int_to_ptr.vmem [resolvable:$false] %s1555_s14 }
  0xb7   : > { %s1557_s9 = scalar_lea.vmem %s1556_s14, 4096  ;;  %p1558_p7 = scmp.lt.s32.totalorder %s2027_s2, %s1556_s14 }
  0xb8   : > { %p1553_p9 = pnand %p1551_p1, %p1537_p11  ;;  %p1559_p3 = scmp.lt.s32.totalorder %s1557_s9, %s1550_s7 }
  0xba   : > { %p1554_p2 = pneg %p1553_p9  ;;  %p1560_p0 = por %p1559_p3, %p1558_p7 }
  0xbc   : > { %p1561_p12 = pnand %p1560_p0, %p1554_p2 }
  0xbe   : > { %1564 = shalt.err (!%p1561_p12)
}
  0xbf   : > { %1336 = dma.hbm_to_vmem [thread:$0]  (!%p2023_p13), %s2032_s23, 2048, %s2027_s2, %s1869_s1, %s2217_s30, %s2217_s30, %s2216_s4  }
  0xc0   : > { %322 = sbr.rel (%p1903_p6) target bundleno = 803 (0x323), region = 40  ;;  %p2225_p11 = scmp.eq.s32.totalorder (!%p1903_p6), %s1842_s10, 0 }
  0xc7   : > { %1630 = dma.done.wait (%p2225_p11), [#allocation7], 2048   ;;  %p2226_p5 = pmov %p2225_p11 }
  0xc8   : > { %s328_s3 = sand.u32 1, %s1842_s10   ;;  %s330_s0 = sand.u32 1, %s1667_s19  }
  0xc9   : > { %1632 = vsyncadd (%p2226_p5), [#allocation7], 4294965248  ;;  %s1008_s24 = sshll.u32 %s330_s0, 7  ;;  %s329_s27 = scalar_lea.sflag [#allocation10], %s328_s3 }
  0xca   : > { %s2071_s29 = scalar_lea.vmem [#allocation9], %s1008_s24  ;;  %p2227_p7 = scmp.ne.s32.totalorder %s2207_s12, 0 }
  0xcc   : > { %1634 = dma.done.wait (%p2227_p7), %s329_s27, 2048  }
  0xcd   : > { %1636 = vsyncadd (%p2227_p7), %s329_s27, 4294965248  ;;  %s339_s1 = sand.u32 1, %s1655_s16   ;;  %p2228_p6 = scmp.ne.s32.totalorder %s2209_s15, 0 }
  0xce   : > { %s1009_s25 = sshll.u32 %s339_s1, 7 }
  0xcf   : > { %s2078_s4 = scalar_lea.vmem [#allocation11], %s1009_s25 }
  0xd0   : > { %1638 = dma.done.wait (%p2228_p6), %s329_s27, 2048  }
  0xd1   : > { %1640 = vsyncadd (%p2228_p6), %s329_s27, 4294965248  ;;  %p2229_p13 = pmov %p2226_p5 }
  0xd2   : > { %p2230_p10 = pmov %p2226_p5 }
  0xd3   : > { %1642 = dma.done.wait (%p2229_p13), [#allocation13], 2048  }
  0xd4   : > { %1644 = vsyncadd (%p2230_p10), [#allocation13], 4294965248  ;;  %s2231_s30 = sld [smem:[#allocation30_spill]] }
  0xda   : > { %p1011_p4 = scmp.ne.s32.totalorder %s2231_s30, 0 }
  0xdb   : > { %v404_v0 = vld [vmem:[#allocation12] sm:$0xff] (!%p1011_p4)  ;;  %v405_v1 = vld [vmem:[#allocation12 + $0x8] sm:$0xff] (!%p1011_p4)  ;;  %v406_v2 = vld [vmem:[#allocation12 + $0x10] sm:$0xff] (!%p1011_p4)  ;;  %s2232_s2 = sld [smem:[#allocation35_spill]] (!%p1011_p4) }
  0xdc   : > { %387 = sbr.rel (%p1011_p4) target bundleno = 482 (0x1e2), region = 60  ;;  %v1195_v3 = vpack.c.bf16 (!%p1011_p4), %v405_v1, %v404_v0  ;;  %v407_v4 = vld [vmem:[#allocation12 + $0x18] sm:$0xff] (!%p1011_p4)  ;;  %v408_v6 = vld [vmem:[#allocation12 + $0x20] sm:$0xff] (!%p1011_p4)  ;;  %v409_v7 = vld [vmem:[#allocation12 + $0x28] sm:$0xff] (!%p1011_p4) }
  0xdd   : > { %v1199_v5 = vpack.c.bf16 (!%p1011_p4), %v407_v4, %v406_v2  ;;  %v1203_v8 = vpack.c.bf16 (!%p1011_p4), %v409_v7, %v408_v6  ;;  %v388_v9 = vld [vmem:[#allocation6] sm:$0xff] (!%p1011_p4)  ;;  %v410_v11 = vld [vmem:[#allocation12 + $0x30] sm:$0xff] (!%p1011_p4)  ;;  %v411_v12 = vld [vmem:[#allocation12 + $0x38] sm:$0xff] (!%p1011_p4) }
  0xde   : > { %1196 = vmatprep.subr.bf16.mxu0 (!%p1011_p4), %v1195_v3  ;;  %1259 = vmatprep.subr.bf16.mxu1 (!%p1011_p4), %v1195_v3  ;;  %v396_v10 = vld [vmem:[#allocation6 + $0x40] sm:$0xff] (!%p1011_p4)  ;;  %v1207_v13 = vpack.c.bf16 (!%p1011_p4), %v411_v12, %v410_v11  ;;  %v413_v15 = vld [vmem:[#allocation12 + $0x48] sm:$0xff] (!%p1011_p4)  ;;  %v414_v17 = vld [vmem:[#allocation12 + $0x50] sm:$0xff] (!%p1011_p4) }
  0xdf   : > { %1198 = vmatpush3.bf16.msra.mxu0 (!%p1011_p4), %v1195_v3  ;;  %1267 = vmatpush3.bf16.msra.mxu1 (!%p1011_p4), %v1195_v3  ;;  %v412_v14 = vld [vmem:[#allocation12 + $0x40] sm:$0xff] (!%p1011_p4)  ;;  %v415_v18 = vld [vmem:[#allocation12 + $0x58] sm:$0xff] (!%p1011_p4)  ;;  %v417_v21 = vld [vmem:[#allocation12 + $0x68] sm:$0xff] (!%p1011_p4) }
  0xe0   : > { %1200 = vmatprep.subr.bf16.mxu0 (!%p1011_p4), %v1199_v5  ;;  %1260 = vmatprep.subr.bf16.mxu1 (!%p1011_p4), %v1199_v5  ;;  %v1211_v16 = vpack.c.bf16 (!%p1011_p4), %v413_v15, %v412_v14  ;;  %v1215_v19 = vpack.c.bf16 (!%p1011_p4), %v415_v18, %v414_v17  ;;  %v416_v20 = vld [vmem:[#allocation12 + $0x60] sm:$0xff] (!%p1011_p4)  ;;  %v418_v23 = vld [vmem:[#allocation12 + $0x70] sm:$0xff] (!%p1011_p4)  ;;  %v419_v24 = vld [vmem:[#allocation12 + $0x78] sm:$0xff] (!%p1011_p4) }
  0xe1   : > { %1115 = vmatprep.mubr.f32.mxu0 (!%p1011_p4), %v388_v9  ;;  %1127 = vmatprep.mubr.f32.mxu1 (!%p1011_p4), %v396_v10  ;;  %v1219_v22 = vpack.c.bf16 (!%p1011_p4), %v417_v21, %v416_v20  ;;  %v1223_v25 = vpack.c.bf16 (!%p1011_p4), %v419_v24, %v418_v23  ;;  %v389_v26 = vld [vmem:[#allocation6 + $0x8] sm:$0xff] (!%p1011_p4)  ;;  %v390_v28 = vld [vmem:[#allocation6 + $0x10] sm:$0xff] (!%p1011_p4)  ;;  %v391_v30 = vld [vmem:[#allocation6 + $0x18] sm:$0xff] (!%p1011_p4) }
  0xe2   : > { %v397_v27 = vld [vmem:[#allocation6 + $0x48] sm:$0xff] (!%p1011_p4)  ;;  %v398_v29 = vld [vmem:[#allocation6 + $0x50] sm:$0xff] (!%p1011_p4)  ;;  %v399_v31 = vld [vmem:[#allocation6 + $0x58] sm:$0xff] (!%p1011_p4) }
  0xe3   : > { %1202 = vmatpush3.bf16.msra.mxu0 %v1199_v5  ;;  %1268 = vmatpush3.bf16.msra.mxu1 %v1199_v5  ;;  %v392_v32 = vld [vmem:[#allocation6 + $0x20] sm:$0xff]  ;;  %v393_v34 = vld [vmem:[#allocation6 + $0x28] sm:$0xff]  ;;  %v394_v36 = vld [vmem:[#allocation6 + $0x30] sm:$0xff] }
  0xe4   : > { %1204 = vmatprep.subr.bf16.mxu0 %v1203_v8  ;;  %1261 = vmatprep.subr.bf16.mxu1 %v1203_v8  ;;  %v400_v33 = vld [vmem:[#allocation6 + $0x60] sm:$0xff]  ;;  %v401_v35 = vld [vmem:[#allocation6 + $0x68] sm:$0xff]  ;;  %v402_v37 = vld [vmem:[#allocation6 + $0x70] sm:$0xff] }
  0xe5   : > { %v395_v38 = vld [vmem:[#allocation6 + $0x38] sm:$0xff]  ;;  %v1012_v40 = vld [vmem:[%s2232_s2] ss:$0 sm:$0xff] }
  0xe6   : > { %v403_v39 = vld [vmem:[#allocation6 + $0x78] sm:$0xff] }
  0xe7   : > { %1206 = vmatpush3.bf16.msra.mxu0 %v1203_v8  ;;  %1269 = vmatpush3.bf16.msra.mxu1 %v1203_v8 }
  0xe8   : > { %1208 = vmatprep.subr.bf16.mxu0 %v1207_v13  ;;  %1262 = vmatprep.subr.bf16.mxu1 %v1207_v13 }
  0xeb   : > { %1210 = vmatpush3.bf16.msra.mxu0 %v1207_v13  ;;  %1270 = vmatpush3.bf16.msra.mxu1 %v1207_v13 }
  0xec   : > { %1212 = vmatprep.subr.bf16.mxu0 %v1211_v16  ;;  %1263 = vmatprep.subr.bf16.mxu1 %v1211_v16 }
  0xef   : > { %1214 = vmatpush3.bf16.msra.mxu0 %v1211_v16  ;;  %1271 = vmatpush3.bf16.msra.mxu1 %v1211_v16 }
  0xf0   : > { %1216 = vmatprep.subr.bf16.mxu0 %v1215_v19  ;;  %1264 = vmatprep.subr.bf16.mxu1 %v1215_v19 }
  0xf3   : > { %1218 = vmatpush3.bf16.msra.mxu0 %v1215_v19  ;;  %1272 = vmatpush3.bf16.msra.mxu1 %v1215_v19 }
  0xf4   : > { %1220 = vmatprep.subr.bf16.mxu0 %v1219_v22  ;;  %1265 = vmatprep.subr.bf16.mxu1 %v1219_v22 }
  0xf7   : > { %1222 = vmatpush3.bf16.msra.mxu0 %v1219_v22  ;;  %1273 = vmatpush3.bf16.msra.mxu1 %v1219_v22 }
  0xf8   : > { %1224 = vmatprep.subr.bf16.mxu0 %v1223_v25  ;;  %1266 = vmatprep.subr.bf16.mxu1 %v1223_v25 }
  0xfb   : > { %1226 = vmatpush3.bf16.msra.mxu0 %v1223_v25  ;;  %1274 = vmatpush3.bf16.msra.mxu1 %v1223_v25 }
  0xfe   : > { %1116 = vmatmul.mubr.f32.vlgmr.msra.gmra.mrb[0].mxu0 %v389_v26  ;;  %1128 = vmatmul.mubr.f32.vlgmr.msra.gmra.mrb[0].mxu1 %v397_v27 }
  0xff   : > { %1118 = vmatprep.mubr.f32.mxu0 %v390_v28  ;;  %1130 = vmatprep.mubr.f32.mxu1 %v398_v29 }
 0x102   : > { %1119 = vmatmul.mubr.f32.gmra.mrb[2].mxu0 %v391_v30  ;;  %1131 = vmatmul.mubr.f32.gmra.mrb[2].mxu1 %v399_v31 }
 0x103   : > { %1121 = vmatprep.mubr.f32.mxu0 %v392_v32  ;;  %1133 = vmatprep.mubr.f32.mxu1 %v400_v33 }
 0x106   : > { %1122 = vmatmul.mubr.f32.gmra.mrb[4].mxu0 %v393_v34  ;;  %1134 = vmatmul.mubr.f32.gmra.mrb[4].mxu1 %v401_v35 }
 0x107   : > { %1124 = vmatprep.mubr.f32.mxu0 %v394_v36  ;;  %1136 = vmatprep.mubr.f32.mxu1 %v402_v37 }
 0x10a   : > { %1125 = vmatmul.mubr.f32.gmra.mrb[6].mxu0 %v395_v38  ;;  %1137 = vmatmul.mubr.f32.gmra.mrb[6].mxu1 %v403_v39 }
 0x1d1   : > { %v1117_v41 = vpop.f32.mrb[0].mxu0  ;;  %v1129_v42 = vpop.f32.mrb[0].mxu1 }
 0x1d2   : > { %v499_v43 = vadd.f32 %v1117_v41, %v1012_v40  ;;  %v539_v44 = vadd.f32 %v1129_v42, %v1012_v40  ;;  %v493_v45 = vpop.f32.mrb[1].mxu0  ;;  %v533_v46 = vpop.f32.mrb[1].mxu1 }
 0x1d3   : > { %v494_v47 = vadd.f32 %v1012_v40, %v493_v45  ;;  %v534_v48 = vadd.f32 %v1012_v40, %v533_v46 }
 0x1d4   : > { %573 = vst [vmem:[#allocation14 + $0x8] sm:$0xff] %v499_v43  ;;  %581 = vst [vmem:[#allocation14 + $0x48] sm:$0xff] %v539_v44 }
 0x1d5   : > { %572 = vst [vmem:[#allocation14] sm:$0xff] %v494_v47  ;;  %580 = vst [vmem:[#allocation14 + $0x40] sm:$0xff] %v534_v48  ;;  %v1120_v49 = vpop.f32.mrb[2].mxu0  ;;  %v1132_v50 = vpop.f32.mrb[2].mxu1 }
 0x1d6   : > { %v509_v51 = vadd.f32 %v1120_v49, %v1012_v40  ;;  %v549_v52 = vadd.f32 %v1132_v50, %v1012_v40  ;;  %v503_v53 = vpop.f32.mrb[3].mxu0  ;;  %v543_v54 = vpop.f32.mrb[3].mxu1 }
 0x1d7   : > { %v504_v55 = vadd.f32 %v1012_v40, %v503_v53  ;;  %v544_v56 = vadd.f32 %v1012_v40, %v543_v54 }
 0x1d8   : > { %575 = vst [vmem:[#allocation14 + $0x18] sm:$0xff] %v509_v51  ;;  %583 = vst [vmem:[#allocation14 + $0x58] sm:$0xff] %v549_v52 }
 0x1d9   : > { %574 = vst [vmem:[#allocation14 + $0x10] sm:$0xff] %v504_v55  ;;  %582 = vst [vmem:[#allocation14 + $0x50] sm:$0xff] %v544_v56  ;;  %v1123_v57 = vpop.f32.mrb[4].mxu0  ;;  %v1135_v58 = vpop.f32.mrb[4].mxu1 }
 0x1da   : > { %v519_v59 = vadd.f32 %v1123_v57, %v1012_v40  ;;  %v559_v60 = vadd.f32 %v1135_v58, %v1012_v40  ;;  %v513_v61 = vpop.f32.mrb[5].mxu0  ;;  %v553_v62 = vpop.f32.mrb[5].mxu1 }
 0x1db   : > { %v514_v63 = vadd.f32 %v1012_v40, %v513_v61  ;;  %v554_v0 = vadd.f32 %v1012_v40, %v553_v62 }
 0x1dc   : > { %577 = vst [vmem:[#allocation14 + $0x28] sm:$0xff] %v519_v59  ;;  %585 = vst [vmem:[#allocation14 + $0x68] sm:$0xff] %v559_v60 }
 0x1dd   : > { %576 = vst [vmem:[#allocation14 + $0x20] sm:$0xff] %v514_v63  ;;  %584 = vst [vmem:[#allocation14 + $0x60] sm:$0xff] %v554_v0  ;;  %v1126_v1 = vpop.f32.mrb[6].mxu0  ;;  %v1138_v2 = vpop.f32.mrb[6].mxu1 }
 0x1de   : > { %v529_v3 = vadd.f32 %v1126_v1, %v1012_v40  ;;  %v569_v4 = vadd.f32 %v1138_v2, %v1012_v40  ;;  %v523_v5 = vpop.f32.mrb[7].mxu0  ;;  %v563_v6 = vpop.f32.mrb[7].mxu1 }
 0x1df   : > { %v524_v7 = vadd.f32 %v1012_v40, %v523_v5  ;;  %v564_v8 = vadd.f32 %v1012_v40, %v563_v6 }
 0x1e0   : > { %579 = vst [vmem:[#allocation14 + $0x38] sm:$0xff] %v529_v3  ;;  %587 = vst [vmem:[#allocation14 + $0x78] sm:$0xff] %v569_v4 }
 0x1e1   : > { %578 = vst [vmem:[#allocation14 + $0x30] sm:$0xff] %v524_v7  ;;  %586 = vst [vmem:[#allocation14 + $0x70] sm:$0xff] %v564_v8 }
 0x1e2 PF: > { %s588_s23 = sld [smem:[#allocation5]]  ;;  %s2233_s11 = sld [smem:[#allocation30_spill]] }
 0x1e8   : > { %p1013_p8 = scmp.ge.s32.totalorder %s2233_s11, %s588_s23 }
 0x1e9   : > { %v625_v9 = vld [vmem:[%s2078_s4] sm:$0xff] (!%p1013_p8)  ;;  %v626_v10 = vld [vmem:[%s2078_s4 + $0x8] sm:$0xff] (!%p1013_p8)  ;;  %v627_v11 = vld [vmem:[%s2078_s4 + $0x10] sm:$0xff] (!%p1013_p8) }
 0x1ea   : > { %592 = sbr.rel (%p1013_p8) target bundleno = 752 (0x2f0), region = 64  ;;  %v1227_v12 = vpack.c.bf16 (!%p1013_p8), %v626_v10, %v625_v9  ;;  %v628_v13 = vld [vmem:[%s2078_s4 + $0x18] sm:$0xff] (!%p1013_p8)  ;;  %v629_v15 = vld [vmem:[%s2078_s4 + $0x20] sm:$0xff] (!%p1013_p8)  ;;  %v630_v16 = vld [vmem:[%s2078_s4 + $0x28] sm:$0xff] (!%p1013_p8) }
 0x1eb   : > { %v1231_v14 = vpack.c.bf16 (!%p1013_p8), %v628_v13, %v627_v11  ;;  %v1235_v17 = vpack.c.bf16 (!%p1013_p8), %v630_v16, %v629_v15  ;;  %v609_v18 = vld [vmem:[%s2071_s29] sm:$0xff] (!%p1013_p8)  ;;  %v631_v20 = vld [vmem:[%s2078_s4 + $0x30] sm:$0xff] (!%p1013_p8)  ;;  %v632_v21 = vld [vmem:[%s2078_s4 + $0x38] sm:$0xff] (!%p1013_p8) }
 0x1ec   : > { %1228 = vmatprep.subr.bf16.mxu0 (!%p1013_p8), %v1227_v12  ;;  %1275 = vmatprep.subr.bf16.mxu1 (!%p1013_p8), %v1227_v12  ;;  %v617_v19 = vld [vmem:[%s2071_s29 + $0x40] sm:$0xff] (!%p1013_p8)  ;;  %v1239_v22 = vpack.c.bf16 (!%p1013_p8), %v632_v21, %v631_v20  ;;  %v634_v24 = vld [vmem:[%s2078_s4 + $0x48] sm:$0xff] (!%p1013_p8)  ;;  %v635_v26 = vld [vmem:[%s2078_s4 + $0x50] sm:$0xff] (!%p1013_p8) }
 0x1ed   : > { %1230 = vmatpush3.bf16.msra.mxu0 (!%p1013_p8), %v1227_v12  ;;  %1283 = vmatpush3.bf16.msra.mxu1 (!%p1013_p8), %v1227_v12  ;;  %v633_v23 = vld [vmem:[%s2078_s4 + $0x40] sm:$0xff] (!%p1013_p8)  ;;  %v636_v27 = vld [vmem:[%s2078_s4 + $0x58] sm:$0xff] (!%p1013_p8)  ;;  %v638_v30 = vld [vmem:[%s2078_s4 + $0x68] sm:$0xff] (!%p1013_p8) }
 0x1ee   : > { %1232 = vmatprep.subr.bf16.mxu0 (!%p1013_p8), %v1231_v14  ;;  %1276 = vmatprep.subr.bf16.mxu1 (!%p1013_p8), %v1231_v14  ;;  %v1243_v25 = vpack.c.bf16 (!%p1013_p8), %v634_v24, %v633_v23  ;;  %v1247_v28 = vpack.c.bf16 (!%p1013_p8), %v636_v27, %v635_v26  ;;  %v637_v29 = vld [vmem:[%s2078_s4 + $0x60] sm:$0xff] (!%p1013_p8)  ;;  %v639_v32 = vld [vmem:[%s2078_s4 + $0x70] sm:$0xff] (!%p1013_p8)  ;;  %v640_v33 = vld [vmem:[%s2078_s4 + $0x78] sm:$0xff] (!%p1013_p8) }
 0x1ef   : > { %1171 = vmatprep.mubr.f32.mxu0 (!%p1013_p8), %v609_v18  ;;  %1183 = vmatprep.mubr.f32.mxu1 (!%p1013_p8), %v617_v19  ;;  %v1251_v31 = vpack.c.bf16 (!%p1013_p8), %v638_v30, %v637_v29  ;;  %v1255_v34 = vpack.c.bf16 (!%p1013_p8), %v640_v33, %v639_v32  ;;  %v610_v35 = vld [vmem:[%s2071_s29 + $0x8] sm:$0xff] (!%p1013_p8)  ;;  %v611_v37 = vld [vmem:[%s2071_s29 + $0x10] sm:$0xff] (!%p1013_p8)  ;;  %v612_v39 = vld [vmem:[%s2071_s29 + $0x18] sm:$0xff] (!%p1013_p8) }
 0x1f0   : > { %v618_v36 = vld [vmem:[%s2071_s29 + $0x48] sm:$0xff] (!%p1013_p8)  ;;  %v619_v38 = vld [vmem:[%s2071_s29 + $0x50] sm:$0xff] (!%p1013_p8)  ;;  %v620_v40 = vld [vmem:[%s2071_s29 + $0x58] sm:$0xff] (!%p1013_p8) }
 0x1f1   : > { %1234 = vmatpush3.bf16.msra.mxu0 %v1231_v14  ;;  %1284 = vmatpush3.bf16.msra.mxu1 %v1231_v14  ;;  %v613_v41 = vld [vmem:[%s2071_s29 + $0x20] sm:$0xff]  ;;  %v614_v43 = vld [vmem:[%s2071_s29 + $0x28] sm:$0xff]  ;;  %v615_v45 = vld [vmem:[%s2071_s29 + $0x30] sm:$0xff] }
 0x1f2   : > { %1236 = vmatprep.subr.bf16.mxu0 %v1235_v17  ;;  %1277 = vmatprep.subr.bf16.mxu1 %v1235_v17  ;;  %v621_v42 = vld [vmem:[%s2071_s29 + $0x60] sm:$0xff]  ;;  %v622_v44 = vld [vmem:[%s2071_s29 + $0x68] sm:$0xff]  ;;  %v623_v46 = vld [vmem:[%s2071_s29 + $0x70] sm:$0xff] }
 0x1f3   : > { %v616_v47 = vld [vmem:[%s2071_s29 + $0x38] sm:$0xff]  ;;  %v594_v49 = vld [vmem:[#allocation14 + $0x8] sm:$0xff]  ;;  %v593_v51 = vld [vmem:[#allocation14] sm:$0xff] }
 0x1f4   : > { %v624_v48 = vld [vmem:[%s2071_s29 + $0x78] sm:$0xff]  ;;  %v602_v50 = vld [vmem:[#allocation14 + $0x48] sm:$0xff]  ;;  %v601_v52 = vld [vmem:[#allocation14 + $0x40] sm:$0xff] }
 0x1f5   : > { %1238 = vmatpush3.bf16.msra.mxu0 %v1235_v17  ;;  %1285 = vmatpush3.bf16.msra.mxu1 %v1235_v17  ;;  %v596_v61 = vld [vmem:[#allocation14 + $0x18] sm:$0xff]  ;;  %v595_v63 = vld [vmem:[#allocation14 + $0x10] sm:$0xff]  ;;  %v598_v9 = vld [vmem:[#allocation14 + $0x28] sm:$0xff] }
 0x1f6   : > { %1240 = vmatprep.subr.bf16.mxu0 %v1239_v22  ;;  %1278 = vmatprep.subr.bf16.mxu1 %v1239_v22  ;;  %v604_v62 = vld [vmem:[#allocation14 + $0x58] sm:$0xff]  ;;  %v603_v0 = vld [vmem:[#allocation14 + $0x50] sm:$0xff]  ;;  %v606_v10 = vld [vmem:[#allocation14 + $0x68] sm:$0xff] }
 0x1f7   : > { %v597_v11 = vld [vmem:[#allocation14 + $0x20] sm:$0xff]  ;;  %v600_v21 = vld [vmem:[#allocation14 + $0x38] sm:$0xff]  ;;  %v599_v23 = vld [vmem:[#allocation14 + $0x30] sm:$0xff] }
 0x1f8   : > { %v605_v12 = vld [vmem:[#allocation14 + $0x60] sm:$0xff]  ;;  %v607_v24 = vld [vmem:[#allocation14 + $0x70] sm:$0xff] }
 0x1f9   : > { %1242 = vmatpush3.bf16.msra.mxu0 %v1239_v22  ;;  %1286 = vmatpush3.bf16.msra.mxu1 %v1239_v22  ;;  %v608_v22 = vld [vmem:[#allocation14 + $0x78] sm:$0xff] }
 0x1fa   : > { %1244 = vmatprep.subr.bf16.mxu0 %v1243_v25  ;;  %1279 = vmatprep.subr.bf16.mxu1 %v1243_v25 }
 0x1fd   : > { %1246 = vmatpush3.bf16.msra.mxu0 %v1243_v25  ;;  %1287 = vmatpush3.bf16.msra.mxu1 %v1243_v25 }
 0x1fe   : > { %1248 = vmatprep.subr.bf16.mxu0 %v1247_v28  ;;  %1280 = vmatprep.subr.bf16.mxu1 %v1247_v28 }
 0x201   : > { %1250 = vmatpush3.bf16.msra.mxu0 %v1247_v28  ;;  %1288 = vmatpush3.bf16.msra.mxu1 %v1247_v28 }
 0x202   : > { %1252 = vmatprep.subr.bf16.mxu0 %v1251_v31  ;;  %1281 = vmatprep.subr.bf16.mxu1 %v1251_v31 }
 0x205   : > { %1254 = vmatpush3.bf16.msra.mxu0 %v1251_v31  ;;  %1289 = vmatpush3.bf16.msra.mxu1 %v1251_v31 }
 0x206   : > { %1256 = vmatprep.subr.bf16.mxu0 %v1255_v34  ;;  %1282 = vmatprep.subr.bf16.mxu1 %v1255_v34 }
 0x209   : > { %1258 = vmatpush3.bf16.msra.mxu0 %v1255_v34  ;;  %1290 = vmatpush3.bf16.msra.mxu1 %v1255_v34 }
 0x20c   : > { %1172 = vmatmul.mubr.f32.vlgmr.msra.gmra.mrb[0].mxu0 %v610_v35  ;;  %1184 = vmatmul.mubr.f32.vlgmr.msra.gmra.mrb[0].mxu1 %v618_v36 }
 0x20d   : > { %1174 = vmatprep.mubr.f32.mxu0 %v611_v37  ;;  %1186 = vmatprep.mubr.f32.mxu1 %v619_v38 }
 0x210   : > { %1175 = vmatmul.mubr.f32.gmra.mrb[2].mxu0 %v612_v39  ;;  %1187 = vmatmul.mubr.f32.gmra.mrb[2].mxu1 %v620_v40 }
 0x211   : > { %1177 = vmatprep.mubr.f32.mxu0 %v613_v41  ;;  %1189 = vmatprep.mubr.f32.mxu1 %v621_v42 }
 0x214   : > { %1178 = vmatmul.mubr.f32.gmra.mrb[4].mxu0 %v614_v43  ;;  %1190 = vmatmul.mubr.f32.gmra.mrb[4].mxu1 %v622_v44 }
 0x215   : > { %1180 = vmatprep.mubr.f32.mxu0 %v615_v45  ;;  %1192 = vmatprep.mubr.f32.mxu1 %v623_v46 }
 0x218   : > { %1181 = vmatmul.mubr.f32.gmra.mrb[6].mxu0 %v616_v47  ;;  %1193 = vmatmul.mubr.f32.gmra.mrb[6].mxu1 %v624_v48 }
 0x2df   : > { %v1173_v53 = vpop.f32.mrb[0].mxu0  ;;  %v1185_v54 = vpop.f32.mrb[0].mxu1 }
 0x2e0   : > { %v787_v55 = vadd.f32 %v1173_v53, %v594_v49  ;;  %v795_v56 = vadd.f32 %v1185_v54, %v602_v50  ;;  %v707_v57 = vpop.f32.mrb[1].mxu0  ;;  %v747_v58 = vpop.f32.mrb[1].mxu1 }
 0x2e1   : > { %v786_v59 = vadd.f32 %v707_v57, %v593_v51  ;;  %v794_v60 = vadd.f32 %v747_v58, %v601_v52 }
 0x2e2   : > { %803 = vst [vmem:[#allocation14 + $0x8] sm:$0xff] %v787_v55  ;;  %811 = vst [vmem:[#allocation14 + $0x48] sm:$0xff] %v795_v56 }
 0x2e3   : > { %802 = vst [vmem:[#allocation14] sm:$0xff] %v786_v59  ;;  %810 = vst [vmem:[#allocation14 + $0x40] sm:$0xff] %v794_v60  ;;  %v1176_v1 = vpop.f32.mrb[2].mxu0  ;;  %v1188_v2 = vpop.f32.mrb[2].mxu1 }
 0x2e4   : > { %v789_v3 = vadd.f32 %v1176_v1, %v596_v61  ;;  %v797_v4 = vadd.f32 %v1188_v2, %v604_v62  ;;  %v717_v5 = vpop.f32.mrb[3].mxu0  ;;  %v757_v6 = vpop.f32.mrb[3].mxu1 }
 0x2e5   : > { %v788_v7 = vadd.f32 %v717_v5, %v595_v63  ;;  %v796_v8 = vadd.f32 %v757_v6, %v603_v0 }
 0x2e6   : > { %805 = vst [vmem:[#allocation14 + $0x18] sm:$0xff] %v789_v3  ;;  %813 = vst [vmem:[#allocation14 + $0x58] sm:$0xff] %v797_v4 }
 0x2e7   : > { %804 = vst [vmem:[#allocation14 + $0x10] sm:$0xff] %v788_v7  ;;  %812 = vst [vmem:[#allocation14 + $0x50] sm:$0xff] %v796_v8  ;;  %v1179_v13 = vpop.f32.mrb[4].mxu0  ;;  %v1191_v14 = vpop.f32.mrb[4].mxu1 }
 0x2e8   : > { %v791_v15 = vadd.f32 %v1179_v13, %v598_v9  ;;  %v799_v16 = vadd.f32 %v1191_v14, %v606_v10  ;;  %v727_v17 = vpop.f32.mrb[5].mxu0  ;;  %v767_v18 = vpop.f32.mrb[5].mxu1 }
 0x2e9   : > { %v790_v19 = vadd.f32 %v727_v17, %v597_v11  ;;  %v798_v20 = vadd.f32 %v767_v18, %v605_v12 }
 0x2ea   : > { %807 = vst [vmem:[#allocation14 + $0x28] sm:$0xff] %v791_v15  ;;  %815 = vst [vmem:[#allocation14 + $0x68] sm:$0xff] %v799_v16 }
 0x2eb   : > { %806 = vst [vmem:[#allocation14 + $0x20] sm:$0xff] %v790_v19  ;;  %814 = vst [vmem:[#allocation14 + $0x60] sm:$0xff] %v798_v20  ;;  %v1182_v25 = vpop.f32.mrb[6].mxu0  ;;  %v1194_v26 = vpop.f32.mrb[6].mxu1 }
 0x2ec   : > { %v793_v27 = vadd.f32 %v1182_v25, %v600_v21  ;;  %v801_v28 = vadd.f32 %v1194_v26, %v608_v22  ;;  %v737_v29 = vpop.f32.mrb[7].mxu0  ;;  %v777_v30 = vpop.f32.mrb[7].mxu1 }
 0x2ed   : > { %v792_v31 = vadd.f32 %v737_v29, %v599_v23  ;;  %v800_v32 = vadd.f32 %v777_v30, %v607_v24 }
 0x2ee   : > { %809 = vst [vmem:[#allocation14 + $0x38] sm:$0xff] %v793_v27  ;;  %817 = vst [vmem:[#allocation14 + $0x78] sm:$0xff] %v801_v28 }
 0x2ef   : > { %808 = vst [vmem:[#allocation14 + $0x30] sm:$0xff] %v792_v31  ;;  %816 = vst [vmem:[#allocation14 + $0x70] sm:$0xff] %v800_v32 }
 0x2f0 PF: > { %s2234_s13 = sld [smem:[#allocation30_spill]] }
 0x2f6   : > { %p1014_p1 = scmp.ne.s32.totalorder %s2234_s13, 7 }
 0x2f7   : > { %v822_v33 = vld [vmem:[#allocation14] sm:$0xff] (!%p1014_p1)  ;;  %v823_v34 = vld [vmem:[#allocation14 + $0x8] sm:$0xff] (!%p1014_p1)  ;;  %v824_v35 = vld [vmem:[#allocation14 + $0x10] sm:$0xff] (!%p1014_p1) }
 0x2f8   : > { %821 = sbr.rel (%p1014_p1) target bundleno = 771 (0x303), region = 68  ;;  %v838_v36 = vmax.f32 (!%p1014_p1), %v822_v33, 0.0  ;;  %v839_v37 = vmax.f32 (!%p1014_p1), %v823_v34, 0.0  ;;  %v840_v38 = vmax.f32 (!%p1014_p1), %v824_v35, 0.0  ;;  %v825_v39 = vld [vmem:[#allocation14 + $0x18] sm:$0xff] (!%p1014_p1)  ;;  %v826_v40 = vld [vmem:[#allocation14 + $0x20] sm:$0xff] (!%p1014_p1) }
 0x2f9   : > { %v827_v41 = vld [vmem:[#allocation14 + $0x28] sm:$0xff] (!%p1014_p1)  ;;  %v841_v42 = vmax.f32 (!%p1014_p1), %v825_v39, 0.0  ;;  %v842_v43 = vmax.f32 (!%p1014_p1), %v826_v40, 0.0  ;;  %v828_v45 = vld [vmem:[#allocation14 + $0x30] sm:$0xff] (!%p1014_p1)  ;;  %v829_v46 = vld [vmem:[#allocation14 + $0x38] sm:$0xff] (!%p1014_p1) }
 0x2fa   : > { %v843_v44 = vmax.f32 (!%p1014_p1), %v827_v41, 0.0  ;;  %v830_v47 = vld [vmem:[#allocation14 + $0x40] sm:$0xff] (!%p1014_p1)  ;;  %854 = vst [vmem:[#allocation14] sm:$0xff] (!%p1014_p1), %v838_v36  ;;  %855 = vst [vmem:[#allocation14 + $0x8] sm:$0xff] (!%p1014_p1), %v839_v37  ;;  %v844_v48 = vmax.f32 (!%p1014_p1), %v828_v45, 0.0  ;;  %v845_v49 = vmax.f32 (!%p1014_p1), %v829_v46, 0.0 }
 0x2fb   : > { %856 = vst [vmem:[#allocation14 + $0x10] sm:$0xff] (!%p1014_p1), %v840_v38  ;;  %v846_v50 = vmax.f32 (!%p1014_p1), %v830_v47, 0.0  ;;  %v831_v51 = vld [vmem:[#allocation14 + $0x48] sm:$0xff] (!%p1014_p1)  ;;  %v832_v52 = vld [vmem:[#allocation14 + $0x50] sm:$0xff] (!%p1014_p1)  ;;  %v833_v53 = vld [vmem:[#allocation14 + $0x58] sm:$0xff] (!%p1014_p1) }
 0x2fc   : > { %857 = vst [vmem:[#allocation14 + $0x18] sm:$0xff] (!%p1014_p1), %v841_v42  ;;  %858 = vst [vmem:[#allocation14 + $0x20] sm:$0xff] (!%p1014_p1), %v842_v43  ;;  %v847_v54 = vmax.f32 (!%p1014_p1), %v831_v51, 0.0  ;;  %v848_v55 = vmax.f32 (!%p1014_p1), %v832_v52, 0.0  ;;  %v849_v56 = vmax.f32 (!%p1014_p1), %v833_v53, 0.0  ;;  %v834_v57 = vld [vmem:[#allocation14 + $0x60] sm:$0xff] (!%p1014_p1) }
 0x2fd   : > { %859 = vst [vmem:[#allocation14 + $0x28] sm:$0xff] (!%p1014_p1), %v843_v44  ;;  %v835_v58 = vld [vmem:[#allocation14 + $0x68] sm:$0xff] (!%p1014_p1)  ;;  %v836_v59 = vld [vmem:[#allocation14 + $0x70] sm:$0xff] (!%p1014_p1)  ;;  %860 = vst [vmem:[#allocation14 + $0x30] sm:$0xff] (!%p1014_p1), %v844_v48  ;;  %v850_v60 = vmax.f32 (!%p1014_p1), %v834_v57, 0.0 }
 0x2fe   : > { %861 = vst [vmem:[#allocation14 + $0x38] sm:$0xff] (!%p1014_p1), %v845_v49  ;;  %862 = vst [vmem:[#allocation14 + $0x40] sm:$0xff] (!%p1014_p1), %v846_v50  ;;  %v851_v61 = vmax.f32 (!%p1014_p1), %v835_v58, 0.0  ;;  %v852_v62 = vmax.f32 (!%p1014_p1), %v836_v59, 0.0  ;;  %v837_v63 = vld [vmem:[#allocation14 + $0x78] sm:$0xff] (!%p1014_p1) }
 0x2ff   : > { %863 = vst [vmem:[#allocation14 + $0x48] sm:$0xff] %v847_v54  ;;  %864 = vst [vmem:[#allocation14 + $0x50] sm:$0xff] %v848_v55  ;;  %v853_v0 = vmax.f32 %v837_v63, 0.0 }
 0x300   : > { %865 = vst [vmem:[#allocation14 + $0x58] sm:$0xff] %v849_v56  ;;  %866 = vst [vmem:[#allocation14 + $0x60] sm:$0xff] %v850_v60 }
 0x301   : > { %867 = vst [vmem:[#allocation14 + $0x68] sm:$0xff] %v851_v61  ;;  %868 = vst [vmem:[#allocation14 + $0x70] sm:$0xff] %v852_v62 }
 0x302   : > { %869 = vst [vmem:[#allocation14 + $0x78] sm:$0xff] %v853_v0 }
 0x303 PF: > { %p1342_p9 = scmp.eq.s32.totalorder %s1842_s10, 7  ;;  %s1693_s18 = smov [#allocation14]  }
 0x304   : > { %s879_s28 = sshll.u32 %s1693_s18, 4  ;;  %s880_s28 = int_to_ptr.vmem [resolvable:$true] %s879_s28 }
 0x305   : > { %s1565_s8 = scalar_lea.vmem %s880_s28, 2048  ;;  %p1572_p12 = scmp.lt.s32.totalorder %s880_s28, %s880_s28 }
 0x306   : > { %p1566_p2 = scmp.ne.s32.totalorder %s880_s28, %s1565_s8  ;;  %p1573_p11 = scmp.lt.s32.totalorder %s1565_s8, %s1565_s8 }
 0x308   : > { %p1567_p3 = pnand %p1566_p2, %p1342_p9  ;;  %p1574_p5 = por %p1573_p11, %p1572_p12 }
 0x30a   : > { %p1568_p0 = pneg %p1567_p3 }
 0x30c   : > { %p1575_p7 = pnand %p1574_p5, %p1568_p0 }
 0x30e   : > { %1578 = shalt.err (!%p1575_p7)
}
 0x30f   : > { %s2235_s14 = sld [smem:[#allocation36_spill]] }
 0x315   : > { %s1579_s9 = scalar_lea.hbm %s2235_s14, 2048 }
 0x316   : > { %p1580_p6 = scmp.ne.s32.totalorder %s2235_s14, %s1579_s9  ;;  %p1585_p4 = scmp.lt.u32.totalorder %s1579_s9, %s2235_s14 }
 0x318   : > { %p1581_p13 = pnand %p1580_p6, %p1342_p9 }
 0x31a   : > { %p1582_p10 = pneg %p1581_p13 }
 0x31c   : > { %p1587_p8 = pnand %p1585_p4, %p1582_p10 }
 0x31e   : > { %1590 = shalt.err (!%p1587_p8)
}
 0x31f   : > { %s1694_s29 = smov 128   ;;  %s1695_s1 = smov 8  }
 0x320   : > { %1312 = dma.vmem_to_hbm [thread:$0]  (%p1342_p9), %s880_s28, 2048, %s2235_s14, [#allocation8], %s1694_s29, %s1694_s29, %s1695_s1  }
 0x321   : > { %1646 = dma.done.wait (%p1342_p9), [#allocation8], 2048  }
 0x322   : > { %1648 = vsyncadd (%p1342_p9), [#allocation8], 4294965248 }
 0x323 PF: > { %s35_s22 = sadd.s32 1, %s1683_s22   ;;  %s2236_s30 = sld [smem:[#allocation29_spill]] }
 0x324   : > { %p32_p1 = scmp.ge.s32.totalorder %s35_s22, 10   ;;  %s2237_s20 = sld [smem:[#allocation32_spill]] }
 0x325   : > { %s2238_s12 = sld [smem:[#allocation31_spill]]  ;;  %s2239_s15 = smov %s1655_s16 }
 0x326   : > { %s2240_s16 = smov %s1659_s17  ;;  %s2241_s17 = smov %s2006_s26 }
 0x327   : > { %s2242_s18 = smov %s1667_s19  ;;  %s2244_s2 = smov %s1679_s21 }
 0x328   :  { %34 = sbr.rel (!%p32_p1) target bundleno = 36 (0x24), region = 111 }
 0x329   : > { %s2243_s19 = smov %s2236_s30 }
 0x32b   : > { %s2245_s21 = smov %s2238_s12 }
 0x32f   :  { %895 = vsyncpa [#allocation7], 1 }
 0x330   :  { %897 = vsyncpa [#allocation7 + $0x1], 1 }
 0x331   :  { %898 = vsyncpa [#allocation10], 1 }
 0x332   :  { %900 = vsyncpa [#allocation10 + $0x1], 1 }
 0x333   :  { %901 = vsyncpa [#allocation13], 1 }
 0x334   :  { %902 = vsyncpa [#allocation8], 1 }
 0x335   :  { %904 = vsyncpa [#allocation8 + $0x1], 1 }

</bundles_post_ra>
